<compile_context>
chip_gen: v6e
topology: v6e:2x2x1
jax: 0.10.0
libtpu: 0.0.40
codegen_flags: <defaults>
</compile_context>

<pallas_src>
import functools

import jax
import jax.numpy as jnp
from jax import lax
from jax.experimental import pallas as pl
from jax.experimental.pallas import tpu as pltpu


def _round_up(a, b):
    return (a + b - 1) // b * b


def prenorm_ffn_kernel(x_ref, g_ref, bt_ref, w1_ref, b1_ref, w2_ref, b2_ref,
                       o_ref, *, dim_true, eps):
    # ---- LayerNorm over the (possibly zero-padded) last axis, stats in f32 ----
    x = x_ref[...].astype(jnp.float32)                      # (tm, dim_p)
    col = lax.broadcasted_iota(jnp.int32, x.shape, dimension=1)
    valid = col < dim_true                                   # static mask for padding
    inv_n = jnp.float32(1.0 / dim_true)

    mean = jnp.sum(x, axis=-1, keepdims=True) * inv_n        # padded cols are 0
    xc = jnp.where(valid, x - mean, 0.0)
    var = jnp.sum(xc * xc, axis=-1, keepdims=True) * inv_n   # biased var (PyTorch)
    inv_std = lax.rsqrt(var + eps)
    xn = xc * inv_std * g_ref[...].astype(jnp.float32) + bt_ref[...].astype(jnp.float32)

    # ---- FeedForward: Linear -> GELU(exact erf) -> Linear ----
    # Feed the MXU in the weights' native dtype (bf16 stays bf16); accumulate f32.
    xn = xn.astype(w1_ref.dtype)
    h = jnp.dot(xn, w1_ref[...], preferred_element_type=jnp.float32)
    h = h + b1_ref[...].astype(jnp.float32)                  # (tm, hid_p)
    # PyTorch nn.GELU() default = exact erf GELU.
    h = 0.5 * h * (1.0 + lax.erf(h * 0.7071067811865476))
    # TODO(synk): dropout with p=0.0 is the identity; no PRNG path wired in.

    h = h.astype(w2_ref.dtype)
    out = jnp.dot(h, w2_ref[...], preferred_element_type=jnp.float32)
    out = out + b2_ref[...].astype(jnp.float32)              # (tm, dim_p)
    o_ref[...] = out.astype(o_ref.dtype)


def prenorm_feed_forward(x, gamma, beta, w1, b1, w2, b2, *, eps=1e-5, tm=256):
    """PreNorm(dim, FeedForward): LayerNorm(x) -> Linear -> GELU -> Linear.

    x: (batch, seq, dim); gamma/beta: (dim,); w1: (dim, hidden); b1: (hidden,);
    w2: (hidden, dim); b2: (dim,).  Returns (batch, seq, dim).
    """
    batch, seq, dim = x.shape
    hidden = w1.shape[1]
    assert w1.shape == (dim, hidden) and w2.shape == (hidden, dim)

    M = batch * seq
    dim_p = _round_up(dim, 128)      # lane-dense feature axes
    hid_p = _round_up(hidden, 128)

    # Row tile: large for throughput, clamped for tiny inputs, multiple of 8.
    tm_eff = _round_up(min(tm, _round_up(M, 8)), 8)
    M_pad = _round_up(M, tm_eff)

    # Zero-pad rows and feature dims. Padded gamma/beta/weight rows-cols are zero,
    # so padded features contribute nothing; LayerNorm stats are masked in-kernel.
    x2d = jnp.pad(x.reshape(M, dim), ((0, M_pad - M), (0, dim_p - dim)))
    g_p = jnp.pad(gamma, (0, dim_p - dim)).reshape(1, dim_p)
    bt_p = jnp.pad(beta, (0, dim_p - dim)).reshape(1, dim_p)
    w1_p = jnp.pad(w1, ((0, dim_p - dim), (0, hid_p - hidden)))
    b1_p = jnp.pad(b1, (0, hid_p - hidden)).reshape(1, hid_p)
    w2_p = jnp.pad(w2, ((0, hid_p - hidden), (0, dim_p - dim)))
    b2_p = jnp.pad(b2, (0, dim_p - dim)).reshape(1, dim_p)

    # VMEM budget: double-buffered I/O + (constant-index) weight blocks + live f32
    # intermediates; cap at 64 MiB so the same plan fits v7x's per-TC VMEM.
    wbytes = jnp.dtype(w1.dtype).itemsize
    xbytes = jnp.dtype(x.dtype).itemsize
    weight_bytes = (dim_p * hid_p + hid_p * dim_p + hid_p + 2 * dim_p) * wbytes
    io_bytes = 2 * tm_eff * dim_p * xbytes
    inter_bytes = tm_eff * (hid_p + dim_p) * 4
    est = 2 * (weight_bytes + io_bytes) + inter_bytes
    vmem_limit = int(min(64 * 1024 * 1024, max(32 * 1024 * 1024, 2 * est)))
    # TODO(synk): for production-size hidden (4*dim) on v7x, add a hidden-dim
    # "arbitrary" grid axis with an f32 accumulator (and/or single-buffer the
    # constant-index weight blocks) instead of holding full (tm, hidden) + weights.

    grid = (M_pad // tm_eff,)
    kernel = functools.partial(prenorm_ffn_kernel, dim_true=dim, eps=eps)

    out2d = pl.pallas_call(
        kernel,
        out_shape=jax.ShapeDtypeStruct((M_pad, dim_p), x.dtype),
        grid_spec=pltpu.PrefetchScalarGridSpec(
            num_scalar_prefetch=0,
            grid=grid,
            in_specs=[
                pl.BlockSpec((tm_eff, dim_p), lambda i: (i, 0)),   # x rows
                pl.BlockSpec((1, dim_p), lambda i: (0, 0)),        # gamma
                pl.BlockSpec((1, dim_p), lambda i: (0, 0)),        # beta
                pl.BlockSpec((dim_p, hid_p), lambda i: (0, 0)),    # W1 (full)
                pl.BlockSpec((1, hid_p), lambda i: (0, 0)),        # b1
                pl.BlockSpec((hid_p, dim_p), lambda i: (0, 0)),    # W2 (full)
                pl.BlockSpec((1, dim_p), lambda i: (0, 0)),        # b2
            ],
            out_specs=pl.BlockSpec((tm_eff, dim_p), lambda i: (i, 0)),
        ),
        compiler_params=pltpu.CompilerParams(
            dimension_semantics=("parallel",),
            vmem_limit_bytes=vmem_limit,
        ),
    )(x2d, g_p, bt_p, w1_p, b1_p, w2_p, b2_p)

    return out2d[:M, :dim].reshape(batch, seq, dim)


def prenorm_feed_forward_ref(x, gamma, beta, w1, b1, w2, b2, eps=1e-5):
    mean = jnp.mean(x, axis=-1, keepdims=True)
    var = jnp.mean((x - mean) ** 2, axis=-1, keepdims=True)
    xn = (x - mean) / jnp.sqrt(var + eps) * gamma + beta
    h = jnp.dot(xn, w1) + b1
    h = 0.5 * h * (1.0 + lax.erf(h / jnp.sqrt(2.0)))
    return jnp.dot(h, w2) + b2


if __name__ == "__main__":
    key = jax.random.PRNGKey(0)
    batch, seq, dim, hidden = 2, 8, 32, 64

    k_x, k_g, k_bt, k_w1, k_b1, k_w2, k_b2 = jax.random.split(key, 7)
    x = jax.random.normal(k_x, (batch, seq, dim), dtype=jnp.float32)
    # LayerNorm affine params (perturbed away from 1/0 so they are exercised).
    gamma = 1.0 + 0.1 * jax.random.normal(k_g, (dim,), dtype=jnp.float32)
    beta = 0.1 * jax.random.normal(k_bt, (dim,), dtype=jnp.float32)
    # Deterministic FFN params (kaiming-uniform-ish scale, not a checkpoint).
    w1 = jax.random.uniform(k_w1, (dim, hidden), jnp.float32, -1.0, 1.0) / jnp.sqrt(dim)
    b1 = jax.random.uniform(k_b1, (hidden,), jnp.float32, -1.0, 1.0) / jnp.sqrt(dim)
    w2 = jax.random.uniform(k_w2, (hidden, dim), jnp.float32, -1.0, 1.0) / jnp.sqrt(hidden)
    b2 = jax.random.uniform(k_b2, (dim,), jnp.float32, -1.0, 1.0) / jnp.sqrt(hidden)

    out = prenorm_feed_forward(x, gamma, beta, w1, b1, w2, b2)
    out = jax.block_until_ready(out)

    ref = prenorm_feed_forward_ref(x, gamma, beta, w1, b1, w2, b2)
    assert out.shape == (batch, seq, dim)
    err = float(jnp.max(jnp.abs(out - ref)))
    assert jnp.allclose(out, ref, atol=2e-4, rtol=2e-4), err

    print("KERNEL_OK")
</pallas_src>

<mosaic_0001>
module attributes {stable_mosaic.version = 11 : i64} {
  func.func @prenorm_ffn_kernel(%arg0: i32, %arg1: memref<16x128xf32, #tpu.memory_space<vmem>>, %arg2: memref<1x128xf32, #tpu.memory_space<vmem>>, %arg3: memref<1x128xf32, #tpu.memory_space<vmem>>, %arg4: memref<128x128xf32, #tpu.memory_space<vmem>>, %arg5: memref<1x128xf32, #tpu.memory_space<vmem>>, %arg6: memref<128x128xf32, #tpu.memory_space<vmem>>, %arg7: memref<1x128xf32, #tpu.memory_space<vmem>>, %arg8: memref<16x128xf32, #tpu.memory_space<vmem>>) attributes {dimension_semantics = [#tpu.dimension_semantics<parallel>], iteration_bounds = array<i64: 1>, scalar_prefetch = 0 : i64, scratch_operands = 0 : i64, tpu.core_type = #tpu.core_type<tc>, window_params = [{transform_indices = @transform_0, window_bounds = array<i64: 16, 128>}, {pipeline_mode = #tpu.pipeline_mode<synchronous>, transform_indices = @transform_1, window_bounds = array<i64: 1, 128>}, {pipeline_mode = #tpu.pipeline_mode<synchronous>, transform_indices = @transform_2, window_bounds = array<i64: 1, 128>}, {pipeline_mode = #tpu.pipeline_mode<synchronous>, transform_indices = @transform_3, window_bounds = array<i64: 128, 128>}, {pipeline_mode = #tpu.pipeline_mode<synchronous>, transform_indices = @transform_4, window_bounds = array<i64: 1, 128>}, {pipeline_mode = #tpu.pipeline_mode<synchronous>, transform_indices = @transform_5, window_bounds = array<i64: 128, 128>}, {pipeline_mode = #tpu.pipeline_mode<synchronous>, transform_indices = @transform_6, window_bounds = array<i64: 1, 128>}, {transform_indices = @transform_7, window_bounds = array<i64: 16, 128>}]} {
    %c0 = arith.constant 0 : index
    %c0_0 = arith.constant 0 : index
    %0 = vector.load %arg1[%c0, %c0_0] : memref<16x128xf32, #tpu.memory_space<vmem>>, vector<16x128xf32>
    %1 = tpu.iota {dimensions = array<i32: 1>} : vector<16x128xi32>
    %c32_i32 = arith.constant 32 : i32
    %2 = vector.broadcast %c32_i32 : i32 to vector<16x128xi32>
    %3 = arith.cmpi slt, %1, %2 : vector<16x128xi32>
    %cst = arith.constant dense<0.000000e+00> : vector<16xf32>
    %4 = vector.multi_reduction <add>, %0, %cst [1] : vector<16x128xf32> to vector<16xf32>
    %5 = vector.shape_cast %4 : vector<16xf32> to vector<16x1xf32>
    %cst_1 = arith.constant 3.125000e-02 : f32
    %6 = vector.broadcast %cst_1 : f32 to vector<16x1xf32>
    %7 = arith.mulf %5, %6 : vector<16x1xf32>
    %8 = vector.broadcast %7 : vector<16x1xf32> to vector<16x128xf32>
    %9 = arith.subf %0, %8 : vector<16x128xf32>
    %cst_2 = arith.constant 0.000000e+00 : f32
    %10 = vector.broadcast %cst_2 : f32 to vector<16x128xf32>
    %11 = arith.select %3, %9, %10 : vector<16x128xi1>, vector<16x128xf32>
    %12 = arith.mulf %11, %11 : vector<16x128xf32>
    %cst_3 = arith.constant dense<0.000000e+00> : vector<16xf32>
    %13 = vector.multi_reduction <add>, %12, %cst_3 [1] : vector<16x128xf32> to vector<16xf32>
    %14 = vector.shape_cast %13 : vector<16xf32> to vector<16x1xf32>
    %cst_4 = arith.constant 3.125000e-02 : f32
    %15 = vector.broadcast %cst_4 : f32 to vector<16x1xf32>
    %16 = arith.mulf %14, %15 : vector<16x1xf32>
    %cst_5 = arith.constant 9.99999974E-6 : f32
    %17 = vector.broadcast %cst_5 : f32 to vector<16x1xf32>
    %18 = arith.addf %16, %17 : vector<16x1xf32>
    %19 = math.rsqrt %18 : vector<16x1xf32>
    %20 = vector.broadcast %19 : vector<16x1xf32> to vector<16x128xf32>
    %21 = arith.mulf %11, %20 : vector<16x128xf32>
    %c0_6 = arith.constant 0 : index
    %c0_7 = arith.constant 0 : index
    %22 = vector.load %arg2[%c0_6, %c0_7] : memref<1x128xf32, #tpu.memory_space<vmem>>, vector<1x128xf32>
    %23 = vector.broadcast %22 : vector<1x128xf32> to vector<16x128xf32>
    %24 = arith.mulf %21, %23 : vector<16x128xf32>
    %c0_8 = arith.constant 0 : index
    %c0_9 = arith.constant 0 : index
    %25 = vector.load %arg3[%c0_8, %c0_9] : memref<1x128xf32, #tpu.memory_space<vmem>>, vector<1x128xf32>
    %26 = vector.broadcast %25 : vector<1x128xf32> to vector<16x128xf32>
    %27 = arith.addf %24, %26 : vector<16x128xf32>
    %c0_10 = arith.constant 0 : index
    %c0_11 = arith.constant 0 : index
    %28 = vector.load %arg4[%c0_10, %c0_11] : memref<128x128xf32, #tpu.memory_space<vmem>>, vector<128x128xf32>
    %cst_12 = arith.constant dense<0.000000e+00> : vector<16x128xf32>
    %29 = tpu.matmul %27, %28, %cst_12 {dimension_numbers = #tpu.dot_dimension_numbers<[1], [0], [0], [1], [0, 0, 1, 1], [], []>} : vector<16x128xf32>, vector<128x128xf32>, vector<16x128xf32> -> vector<16x128xf32>
    %c0_13 = arith.constant 0 : index
    %c0_14 = arith.constant 0 : index
    %30 = vector.load %arg5[%c0_13, %c0_14] : memref<1x128xf32, #tpu.memory_space<vmem>>, vector<1x128xf32>
    %31 = vector.broadcast %30 : vector<1x128xf32> to vector<16x128xf32>
    %32 = arith.addf %29, %31 : vector<16x128xf32>
    %cst_15 = arith.constant 5.000000e-01 : f32
    %33 = vector.broadcast %cst_15 : f32 to vector<16x128xf32>
    %34 = arith.mulf %33, %32 : vector<16x128xf32>
    %cst_16 = arith.constant 0.707106769 : f32
    %35 = vector.broadcast %cst_16 : f32 to vector<16x128xf32>
    %36 = arith.mulf %32, %35 : vector<16x128xf32>
    %37 = math.erf %36 : vector<16x128xf32>
    %cst_17 = arith.constant 1.000000e+00 : f32
    %38 = vector.broadcast %cst_17 : f32 to vector<16x128xf32>
    %39 = arith.addf %38, %37 : vector<16x128xf32>
    %40 = arith.mulf %34, %39 : vector<16x128xf32>
    %c0_18 = arith.constant 0 : index
    %c0_19 = arith.constant 0 : index
    %41 = vector.load %arg6[%c0_18, %c0_19] : memref<128x128xf32, #tpu.memory_space<vmem>>, vector<128x128xf32>
    %cst_20 = arith.constant dense<0.000000e+00> : vector<16x128xf32>
    %42 = tpu.matmul %40, %41, %cst_20 {dimension_numbers = #tpu.dot_dimension_numbers<[1], [0], [0], [1], [0, 0, 1, 1], [], []>} : vector<16x128xf32>, vector<128x128xf32>, vector<16x128xf32> -> vector<16x128xf32>
    %c0_21 = arith.constant 0 : index
    %c0_22 = arith.constant 0 : index
    %43 = vector.load %arg7[%c0_21, %c0_22] : memref<1x128xf32, #tpu.memory_space<vmem>>, vector<1x128xf32>
    %44 = vector.broadcast %43 : vector<1x128xf32> to vector<16x128xf32>
    %45 = arith.addf %42, %44 : vector<16x128xf32>
    %c0_23 = arith.constant 0 : index
    %c0_24 = arith.constant 0 : index
    %46 = vector.load %arg8[%c0_23, %c0_24] : memref<16x128xf32, #tpu.memory_space<vmem>>, vector<16x128xf32>
    tpu.vector_store %arg8[%c0_23, %c0_24], %45 {strides = array<i32>} : memref<16x128xf32, #tpu.memory_space<vmem>>, vector<16x128xf32>,
    return
  }
  func.func @transform_0(%arg0: i32) -> (i32, i32) {
    %c0_i32 = arith.constant 0 : i32
    %c0_i32_0 = arith.constant 0 : i32
    return %arg0, %c0_i32 : i32, i32
  }
  func.func @transform_1(%arg0: i32) -> (i32, i32) {
    %c0_i32 = arith.constant 0 : i32
    %c0_i32_0 = arith.constant 0 : i32
    %c0_i32_1 = arith.constant 0 : i32
    return %c0_i32, %c0_i32_0 : i32, i32
  }
  func.func @transform_2(%arg0: i32) -> (i32, i32) {
    %c0_i32 = arith.constant 0 : i32
    %c0_i32_0 = arith.constant 0 : i32
    %c0_i32_1 = arith.constant 0 : i32
    return %c0_i32, %c0_i32_0 : i32, i32
  }
  func.func @transform_3(%arg0: i32) -> (i32, i32) {
    %c0_i32 = arith.constant 0 : i32
    %c0_i32_0 = arith.constant 0 : i32
    %c0_i32_1 = arith.constant 0 : i32
    return %c0_i32, %c0_i32_0 : i32, i32
  }
  func.func @transform_4(%arg0: i32) -> (i32, i32) {
    %c0_i32 = arith.constant 0 : i32
    %c0_i32_0 = arith.constant 0 : i32
    %c0_i32_1 = arith.constant 0 : i32
    return %c0_i32, %c0_i32_0 : i32, i32
  }
  func.func @transform_5(%arg0: i32) -> (i32, i32) {
    %c0_i32 = arith.constant 0 : i32
    %c0_i32_0 = arith.constant 0 : i32
    %c0_i32_1 = arith.constant 0 : i32
    return %c0_i32, %c0_i32_0 : i32, i32
  }
  func.func @transform_6(%arg0: i32) -> (i32, i32) {
    %c0_i32 = arith.constant 0 : i32
    %c0_i32_0 = arith.constant 0 : i32
    %c0_i32_1 = arith.constant 0 : i32
    return %c0_i32, %c0_i32_0 : i32, i32
  }
  func.func @transform_7(%arg0: i32) -> (i32, i32) {
    %c0_i32 = arith.constant 0 : i32
    %c0_i32_0 = arith.constant 0 : i32
    return %arg0, %c0_i32 : i32, i32
  }
}

</mosaic_0001>

<bundles_post_ra>
// kernel: tpu_custom_call.1
= control target key start
LH: loop header
LB: loop body
LE: loop exit
PB: predicated region body
PF: predicated region fallthrough
CT: control target
= control target key end

     0   :  { %12 = vsyncpa [#allocation3], 0  ;;  %s643_s0 = inlined_call_operand.hbm [shape: f32[16,128], index: 0, kind: input, shape index: {}]   ;;  %s644_s1 = inlined_call_operand.vmem [shape: f32[1,128], index: 1, kind: input, shape index: {}]   ;;  %s645_s2 = inlined_call_operand.vmem [shape: f32[1,128], index: 2, kind: input, shape index: {}]   ;;  %s646_s3 = inlined_call_operand.hbm [shape: f32[128,128], index: 3, kind: input, shape index: {}]   ;;  %s647_s4 = inlined_call_operand.vmem [shape: f32[1,128], index: 4, kind: input, shape index: {}]   ;;  %s648_s5 = inlined_call_operand.hbm [shape: f32[128,128], index: 5, kind: input, shape index: {}]   ;;  %s649_s6 = inlined_call_operand.vmem [shape: f32[1,128], index: 6, kind: input, shape index: {}]   ;;  %s650_s7 = inlined_call_operand.hbm [shape: f32[16,128], index: 7, kind: output, shape index: {}]  }
   0x1   :  { %13 = vsyncpa [#allocation6], 0 }
   0x2   :  { %14 = vsyncpa [#allocation4], 0  ;;  %s551_s24 = smov [#allocation5]   ;;  %s552_s26 = smov [#allocation2]  }
   0x3   :  { %s36_s25 = sshll.u32 %s551_s24, 4  ;;  %s20_s27 = sshll.u32 %s552_s26, 4  ;;  %s37_s25 = int_to_ptr.vmem [resolvable:$true] %s36_s25  ;;  %s21_s27 = int_to_ptr.vmem [resolvable:$true] %s20_s27 }
   0x4   :  { %s473_s28 = scalar_lea.vmem %s37_s25, 2048  ;;  %p478_p1 = scmp.lt.s32.totalorder %s37_s25, %s37_s25 }
   0x5   :  { %p474_p0 = scmp.ne.s32.totalorder %s37_s25, %s473_s28  ;;  %p479_p2 = scmp.lt.s32.totalorder %s473_s28, %s473_s28 }
   0x7   :  { %p480_p3 = por %p479_p2, %p478_p1 }
   0x9   :  { %p481_p4 = pnand %p480_p3, %p474_p0 }
   0xb   :  { %484 = shalt.err (!%p481_p4)
}
   0xc   :  { %s553_s29 = smov 128   ;;  %s554_s30 = smov 8  }
   0xd   :  { %42 = dma.hbm_to_vmem [thread:$0]  %s646_s3, 2048, %s37_s25, [#allocation6], %s553_s29, %s553_s29, %s554_s30  }
   0xe   :  { %s493_s10 = scalar_lea.vmem %s21_s27, 256  ;;  %p498_p6 = scmp.lt.s32.totalorder %s21_s27, %s21_s27 }
   0xf   :  { %p494_p5 = scmp.ne.s32.totalorder %s21_s27, %s493_s10  ;;  %p499_p7 = scmp.lt.s32.totalorder %s493_s10, %s493_s10 }
  0x11   :  { %p500_p8 = por %p499_p7, %p498_p6 }
  0x13   :  { %p501_p9 = pnand %p500_p8, %p494_p5 }
  0x15   :  { %504 = shalt.err (!%p501_p9)
}
  0x16   :  { %26 = dma.hbm_to_vmem [thread:$0]  %s643_s0, 256, %s21_s27, [#allocation3], %s553_s29, %s553_s29, %s554_s30  }
  0x17   :  { %s555_s13 = smov [#allocation7]  }
  0x18   :  { %s50_s14 = sshll.u32 %s555_s13, 4  ;;  %s51_s14 = int_to_ptr.vmem [resolvable:$true] %s50_s14 }
  0x19   :  { %s513_s15 = scalar_lea.vmem %s51_s14, 2048  ;;  %p518_p11 = scmp.lt.s32.totalorder %s51_s14, %s51_s14 }
  0x1a   :  { %p514_p10 = scmp.ne.s32.totalorder %s51_s14, %s513_s15  ;;  %p519_p12 = scmp.lt.s32.totalorder %s513_s15, %s513_s15 }
  0x1c   :  { %p520_p13 = por %p519_p12, %p518_p11 }
  0x1e   :  { %p521_p0 = pnand %p520_p13, %p514_p10 }
  0x20   :  { %524 = shalt.err (!%p521_p0)
}
  0x21   :  { %56 = dma.hbm_to_vmem [thread:$0]  %s648_s5, 2048, %s51_s14, [#allocation6], %s553_s29, %s553_s29, %s554_s30  }
  0x22   :  { %545 = dma.done.wait [#allocation3], 256  }
  0x23   :  { %546 = vsyncadd [#allocation3], 4294967040 }
  0x24   :  { %547 = dma.done.wait [#allocation6], 4096  }
  0x25   :  { %548 = vsyncadd [#allocation6], 4294963200  ;;  %v68_v0 = vld [vmem:[#allocation2] sm:$0xff]  ;;  %v69_v1 = vld [vmem:[#allocation2 + $0x8] sm:$0xff]  ;;  %v70_v4 = vlaneseq  ;;  %s556_s20 = smov [#allocation8]  }
  0x26   :  { %73 = vadd.xlane.f32.xlu0 %v68_v0  ;;  %v130_v2 = vld [vmem:[#allocation5 + $0x78] sm:$0xff]  ;;  %v129_v3 = vld [vmem:[#allocation5 + $0x70] sm:$0xff]  ;;  %v128_v16 = vld [vmem:[#allocation5 + $0x68] sm:$0xff]  ;;  %s328_s21 = sshll.u32 %s556_s20, 4  ;;  %s329_s21 = int_to_ptr.vmem [resolvable:$true] %s328_s21 }
  0x27   :  { %381 = vmatprep.subr.mxu0 %v130_v2  ;;  %v71_v5 = vand.u32 127, %v70_v4  ;;  %v127_v17 = vld [vmem:[#allocation5 + $0x60] sm:$0xff]  ;;  %v126_v18 = vld [vmem:[#allocation5 + $0x58] sm:$0xff]  ;;  %v125_v19 = vld [vmem:[#allocation5 + $0x50] sm:$0xff]  ;;  %s525_s22 = scalar_lea.vmem %s329_s21, 256  ;;  %p530_p2 = scmp.lt.s32.totalorder %s329_s21, %s329_s21 }
  0x28   :  { %382 = vmatpush3.msra.mxu0 %v130_v2  ;;  %v124_v20 = vld [vmem:[#allocation5 + $0x48] sm:$0xff]  ;;  %v123_v21 = vld [vmem:[#allocation5 + $0x40] sm:$0xff]  ;;  %v122_v22 = vld [vmem:[#allocation5 + $0x38] sm:$0xff]  ;;  %p526_p1 = scmp.ne.s32.totalorder %s329_s21, %s525_s22  ;;  %p531_p3 = scmp.lt.s32.totalorder %s525_s22, %s525_s22 }
  0x29   :  { %383 = vmatprep.subr.mxu0 %v129_v3  ;;  %vm72_vm0 = vcmp.lt.s32.totalorder %v71_v5, 32  ;;  %v121_v23 = vld [vmem:[#allocation5 + $0x30] sm:$0xff]  ;;  %v120_v24 = vld [vmem:[#allocation5 + $0x28] sm:$0xff]  ;;  %v119_v25 = vld [vmem:[#allocation5 + $0x20] sm:$0xff] }
  0x2a   :  { %75 = vadd.xlane.f32.xlu0 %v69_v1  ;;  %384 = vmatpush3.msra.mxu0 %v129_v3  ;;  %v118_v26 = vld [vmem:[#allocation5 + $0x18] sm:$0xff]  ;;  %v117_v27 = vld [vmem:[#allocation5 + $0x10] sm:$0xff]  ;;  %v116_v28 = vld [vmem:[#allocation5 + $0x8] sm:$0xff]  ;;  %p532_p4 = por %p531_p3, %p530_p2 }
  0x2b   :  { %385 = vmatprep.subr.mxu0 %v128_v16  ;;  %v115_v29 = vld [vmem:[#allocation5] sm:$0xff]  ;;  %v238_v30 = vld [vmem:[#allocation7 + $0x78] sm:$0xff]  ;;  %v237_v31 = vld [vmem:[#allocation7 + $0x70] sm:$0xff] }
  0x2c   :  { %386 = vmatpush3.msra.mxu0 %v128_v16  ;;  %416 = vmatprep.subr.mxu1 %v238_v30  ;;  %v236_v32 = vld [vmem:[#allocation7 + $0x68] sm:$0xff]  ;;  %v341_v40 = vld [vmem:[%s644_s1] ss:$0 sm:$0xff]  ;;  %v235_v49 = vld [vmem:[#allocation7 + $0x60] sm:$0xff]  ;;  %p533_p5 = pnand %p532_p4, %p526_p1 }
  0x2d   :  { %387 = vmatprep.subr.mxu0 %v127_v17  ;;  %417 = vmatpush3.msra.mxu1 %v238_v30  ;;  %v342_v42 = vld [vmem:[%s645_s2] ss:$0 sm:$0xff]  ;;  %v234_v50 = vld [vmem:[#allocation7 + $0x58] sm:$0xff]  ;;  %v232_v52 = vld [vmem:[#allocation7 + $0x48] sm:$0xff] }
  0x2e   :  { %388 = vmatpush3.msra.mxu0 %v127_v17  ;;  %418 = vmatprep.subr.mxu1 %v237_v31  ;;  %v233_v51 = vld [vmem:[#allocation7 + $0x50] sm:$0xff]  ;;  %v231_v53 = vld [vmem:[#allocation7 + $0x40] sm:$0xff]  ;;  %v230_v54 = vld [vmem:[#allocation7 + $0x38] sm:$0xff] }
  0x2f   :  { %389 = vmatprep.subr.mxu0 %v126_v18  ;;  %419 = vmatpush3.msra.mxu1 %v237_v31  ;;  %v229_v55 = vld [vmem:[#allocation7 + $0x30] sm:$0xff]  ;;  %v228_v56 = vld [vmem:[#allocation7 + $0x28] sm:$0xff]  ;;  %v227_v57 = vld [vmem:[#allocation7 + $0x20] sm:$0xff] }
  0x30   :  { %390 = vmatpush3.msra.mxu0 %v126_v18  ;;  %420 = vmatprep.subr.mxu1 %v236_v32  ;;  %v226_v58 = vld [vmem:[#allocation7 + $0x18] sm:$0xff]  ;;  %v225_v59 = vld [vmem:[#allocation7 + $0x10] sm:$0xff]  ;;  %v224_v60 = vld [vmem:[#allocation7 + $0x8] sm:$0xff] }
  0x31   :  { %391 = vmatprep.subr.mxu0 %v125_v19  ;;  %421 = vmatpush3.msra.mxu1 %v236_v32  ;;  %v223_v61 = vld [vmem:[#allocation7] sm:$0xff]  ;;  %v343_v62 = vld [vmem:[%s647_s4] ss:$0 sm:$0xff] }
  0x32   :  { %392 = vmatpush3.msra.mxu0 %v125_v19  ;;  %422 = vmatprep.subr.mxu1 %v235_v49 }
  0x33   :  { %393 = vmatprep.subr.mxu0 %v124_v20  ;;  %423 = vmatpush3.msra.mxu1 %v235_v49 }
  0x34   :  { %394 = vmatpush3.msra.mxu0 %v124_v20  ;;  %424 = vmatprep.subr.mxu1 %v234_v50 }
  0x35   :  { %395 = vmatprep.subr.mxu0 %v123_v21  ;;  %425 = vmatpush3.msra.mxu1 %v234_v50 }
  0x36   :  { %396 = vmatpush3.msra.mxu0 %v123_v21  ;;  %426 = vmatprep.subr.mxu1 %v233_v51 }
  0x37   :  { %397 = vmatprep.subr.mxu0 %v122_v22  ;;  %427 = vmatpush3.msra.mxu1 %v233_v51 }
  0x38   :  { %398 = vmatpush3.msra.mxu0 %v122_v22  ;;  %428 = vmatprep.subr.mxu1 %v232_v52 }
  0x39   :  { %399 = vmatprep.subr.mxu0 %v121_v23  ;;  %429 = vmatpush3.msra.mxu1 %v232_v52 }
  0x3a   :  { %400 = vmatpush3.msra.mxu0 %v121_v23  ;;  %430 = vmatprep.subr.mxu1 %v231_v53 }
  0x3b   :  { %401 = vmatprep.subr.mxu0 %v120_v24  ;;  %431 = vmatpush3.msra.mxu1 %v231_v53 }
  0x3c   :  { %402 = vmatpush3.msra.mxu0 %v120_v24  ;;  %432 = vmatprep.subr.mxu1 %v230_v54 }
  0x3d   :  { %403 = vmatprep.subr.mxu0 %v119_v25  ;;  %433 = vmatpush3.msra.mxu1 %v230_v54 }
  0x3e   :  { %404 = vmatpush3.msra.mxu0 %v119_v25  ;;  %434 = vmatprep.subr.mxu1 %v229_v55 }
  0x3f   :  { %405 = vmatprep.subr.mxu0 %v118_v26  ;;  %435 = vmatpush3.msra.mxu1 %v229_v55 }
  0x40   :  { %406 = vmatpush3.msra.mxu0 %v118_v26  ;;  %436 = vmatprep.subr.mxu1 %v228_v56 }
  0x41   :  { %407 = vmatprep.subr.mxu0 %v117_v27  ;;  %437 = vmatpush3.msra.mxu1 %v228_v56 }
  0x42   :  { %408 = vmatpush3.msra.mxu0 %v117_v27  ;;  %438 = vmatprep.subr.mxu1 %v227_v57 }
  0x43   :  { %409 = vmatprep.subr.mxu0 %v116_v28  ;;  %439 = vmatpush3.msra.mxu1 %v227_v57 }
  0x44   :  { %410 = vmatpush3.msra.mxu0 %v116_v28  ;;  %440 = vmatprep.subr.mxu1 %v226_v58 }
  0x45   :  { %411 = vmatprep.subr.mxu0 %v115_v29  ;;  %441 = vmatpush3.msra.mxu1 %v226_v58 }
  0x46   :  { %412 = vmatpush3.msra.mxu0 %v115_v29  ;;  %442 = vmatprep.subr.mxu1 %v225_v59 }
  0x47   :  { %443 = vmatpush3.msra.mxu1 %v225_v59 }
  0x48   :  { %444 = vmatprep.subr.mxu1 %v224_v60 }
  0x49   :  { %445 = vmatpush3.msra.mxu1 %v224_v60 }
  0x4a   :  { %446 = vmatprep.subr.mxu1 %v223_v61 }
  0x4b   :  { %447 = vmatpush3.msra.mxu1 %v223_v61 }
  0xaf   :  { %v74_v6 = vpop.xlane.xlu0 %73 }
  0xb0   :  { %v77_v7 = vmul.f32 0.03125, %v74_v6 }
  0xb2   :  { %v79_v8 = vsub.f32 %v68_v0, %v77_v7 }
  0xb3   :  { %v76_v9 = vpop.xlane.xlu0 %75 }
  0xb4   :  { %v78_v10 = vmul.f32 0.03125, %v76_v9  ;;  %v615_v11 = vsel %vm72_vm0, %v79_v8, 0.0 }
  0xb5   :  { %v83_v12 = vmul.f32 %v615_v11, %v615_v11 }
  0xb6   :  { %v80_v13 = vsub.f32 %v69_v1, %v78_v10 }
  0xb7   :  { %85 = vadd.xlane.f32.xlu1 %v83_v12 }
  0xb8   :  { %v619_v14 = vsel %vm72_vm0, %v80_v13, 0.0  ;;  %v344_v13 = vld [vmem:[%s649_s6] ss:$0 sm:$0xff] }
  0xb9   :  { %v84_v15 = vmul.f32 %v619_v14, %v619_v14 }
  0xbb   :  { %87 = vadd.xlane.f32.xlu1 %v84_v15 }
 0x140   :  { %v86_v33 = vpop.xlane.xlu1 %85 }
 0x141   :  { %v89_v34 = vmul.f32 0.03125, %v86_v33 }
 0x143   :  { %v91_v35 = vadd.f32 1e-05, %v89_v34 }
 0x144   :  { %v88_v36 = vpop.xlane.xlu1 %87 }
 0x145   :  { %457 = vrsqrt.f32 %v91_v35  ;;  %v90_v37 = vmul.f32 0.03125, %v88_v36 }
 0x147   :  { %v92_v38 = vadd.f32 1e-05, %v90_v37 }
 0x149   :  { %459 = vrsqrt.f32 %v92_v38 }
 0x152   :  { %v458_v39 = vpop.eup %457 }
 0x153   :  { %v95_v41 = vmul.f32 %v458_v39, %v615_v11 }
 0x155   :  { %v104_v43 = vmul.f32 %v341_v40, %v95_v41 }
 0x156   :  { %v460_v44 = vpop.eup %459 }
 0x157   :  { %v96_v45 = vmul.f32 %v460_v44, %v619_v14  ;;  %v113_v46 = vadd.f32 %v342_v42, %v104_v43 }
 0x159   :  { %v105_v47 = vmul.f32 %v341_v40, %v96_v45  ;;  %413 = vmatprep.mubr.f32.mxu0 %v113_v46 }
 0x15b   :  { %v114_v48 = vadd.f32 %v342_v42, %v105_v47 }
 0x15d   :  { %414 = vmatmul.mubr.f32.vlgmr.msra.gmra.mxu0 %v114_v48 }
 0x21d   :  { %v415_v63 = vpop.f32.mrf.mxu0 }
 0x21e   :  { %v210_v0 = vadd.f32 %v415_v63, %v343_v62 }
 0x21f   :  { %v204_v1 = vpop.f32.mrf.mxu0 }
 0x220   :  { %v216_v2 = vmul.f32 0.70710677, %v210_v0  ;;  %v205_v3 = vadd.f32 %v343_v62, %v204_v1  ;;  %v214_v10 = vmul.f32 0.5, %v210_v0 }
 0x222   :  { %461 = verf.f32 %v216_v2  ;;  %v215_v4 = vmul.f32 0.70710677, %v205_v3  ;;  %v213_v8 = vmul.f32 0.5, %v205_v3 }
 0x224   :  { %463 = verf.f32 %v215_v4 }
 0x22f   :  { %v462_v5 = vpop.eup %461 }
 0x230   :  { %v220_v7 = vadd.f32 1.0, %v462_v5 }
 0x231   :  { %v464_v6 = vpop.eup %463 }
 0x232   :  { %v219_v9 = vadd.f32 1.0, %v464_v6  ;;  %v222_v12 = vmul.f32 %v220_v7, %v214_v10 }
 0x234   :  { %v221_v11 = vmul.f32 %v219_v9, %v213_v8 }
 0x236   :  { %448 = vmatprep.mubr.f32.mxu1 %v221_v11 }
 0x237   :  { %449 = vmatmul.mubr.f32.vlgmr.msra.gmra.mxu1 %v222_v12 }
 0x2f7   :  { %v450_v14 = vpop.f32.mrf.mxu1 }
 0x2f8   :  { %v318_v15 = vadd.f32 %v450_v14, %v344_v13 }
 0x2f9   :  { %v312_v16 = vpop.f32.mrf.mxu1 }
 0x2fa   :  { %322 = vst [vmem:[#allocation8 + $0x8] sm:$0xff] %v318_v15  ;;  %v313_v17 = vadd.f32 %v344_v13, %v312_v16 }
 0x2fc   :  { %321 = vst [vmem:[#allocation8] sm:$0xff] %v313_v17 }
 0x2fd   :  { %536 = shalt.err (!%p533_p5)
}
 0x2fe   :  { %334 = dma.vmem_to_hbm [thread:$0]  %s329_s21, 256, %s650_s7, [#allocation4], %s553_s29, %s553_s29, %s554_s30  }
 0x2ff   :  { %549 = dma.done.wait [#allocation4], 256  }
 0x300   :  { %550 = vsyncadd [#allocation4], 4294967040 }
 0x301   :  { %338 = vsyncpa [#allocation3], 1 }
 0x302   :  { %339 = vsyncpa [#allocation6], 1 }
 0x303   :  { %340 = vsyncpa [#allocation4], 1 }

</bundles_post_ra>
